<compile_context>
chip_gen: v7x
topology: tpu7x:2x2x1
jax: 0.10.0
libtpu: 0.0.40
codegen_flags: <defaults>
</compile_context>

<pallas_src>
import jax
import jax.numpy as jnp
import numpy as np
from jax.experimental import pallas as pl
from jax.experimental.pallas import tpu as pltpu

KERNEL_SET = (2, 3, 6, 7)


def _choose_tn(N, CIN, T, COUT, SEQ, budget_bytes=8 << 20):
    """Largest node tile that fits the double-buffered VMEM budget.

    Prefers TN == N (one block per batch) — fewer grid steps amortize the
    ~0.35 us/step fixed cost on single-TensorCore chips (v5e/v6e); the batch
    grid axis still provides parallel work for v7x's two TensorCores.
    Tiles are divisors of N and multiples of 8 (TPU sublane constraint).
    """
    per_node = 2 * 4 * (CIN * T + COUT * SEQ)   # dbl-buffered x row + out row, f32
    max_tn = max(8, budget_bytes // per_node)
    if N <= max_tn:
        return N                                 # whole node axis in one block
    tn = (max_tn // 8) * 8
    while tn >= 8:
        if N % tn == 0:
            return tn
        tn -= 8
    return N                                     # no clean divisor: one big block


def _fused_kernel(x_ref, a_ref, b1_ref, w2t_ref, b2_ref, o_ref):
    # x_ref  : (CIN, TN, T)      input tile, original NCHW layout (no relayout)
    # a_ref  : (CIN, T, COUT*H)  folded conv + Linear#1 weights
    # b1_ref : (1, COUT*H)       folded conv bias + Linear#1 bias
    # w2t_ref: (H, SEQ)          Linear#2 weight (shared across output channels)
    # b2_ref : (1, SEQ)          Linear#2 bias
    # o_ref  : (COUT, TN, SEQ)   output tile, final NCHW layout
    cin = x_ref.shape[0]
    cout = o_ref.shape[0]
    h_dim = w2t_ref.shape[0]

    # Stage 1: dilated convs + Linear#1 folded into one linear map over (c, t).
    # Per-CIN MXU dots avoid any in-kernel (CIN,TN,T)->(TN,CIN*T) relayout.
    acc = jnp.dot(x_ref[0], a_ref[0], preferred_element_type=jnp.float32)
    for c in range(1, cin):
        acc = acc + jnp.dot(x_ref[c], a_ref[c],
                            preferred_element_type=jnp.float32)
    h = jnp.maximum(acc + b1_ref[...], 0.0)          # (TN, COUT*H), ReLU

    # Stage 2: Linear#2 per output channel; ReLU does not mix channels, so the
    # (H, SEQ) weight is shared and the store lands directly in NCHW layout.
    for o in range(cout):
        y = jnp.dot(h[:, o * h_dim:(o + 1) * h_dim], w2t_ref[...],
                    preferred_element_type=jnp.float32) + b2_ref[...]
        o_ref[o] = y.astype(o_ref.dtype)             # (TN, SEQ)


def _fold_params(params, D, CIN, T, T_OUT):
    """Fold dilated convs + Linear#1 into A_fold; keep Linear#2 per-channel."""
    w1 = params["lin1_w"].astype(jnp.float32)          # (H, T_OUT)
    H = w1.shape[0]
    SEQ = params["lin2_w"].shape[0]
    COUTB = params["conv_w"][0].shape[0]
    COUT = COUTB * len(KERNEL_SET)

    # A[c, t, o, p] = sum_j conv_w[o, c, j] * w1[p, t - off_j]
    blocks = []
    for br, kern in enumerate(KERNEL_SET):
        w = params["conv_w"][br].astype(jnp.float32)   # (COUTB, CIN, kern)
        a_br = jnp.zeros((CIN, T, COUTB, H), jnp.float32)
        for j in range(kern):
            off = D * (KERNEL_SET[-1] - kern + j)      # reproduces x[..., -T_OUT:]
            contrib = jnp.einsum("oc,pt->ctop", w[:, :, j], w1)  # (CIN,T_OUT,COUTB,H)
            a_br = a_br.at[:, off:off + T_OUT].add(contrib)
        blocks.append(a_br)
    a_fold = jnp.concatenate(blocks, axis=2).reshape(CIN, T, COUT * H)

    # B1[o, p] = lin1_b[p] + conv_b[o] * sum_t w1[p, t]
    conv_b = jnp.concatenate([b.reshape(-1) for b in params["conv_b"]]
                             ).astype(jnp.float32)      # (COUT,)
    s1 = jnp.sum(w1, axis=1)                            # (H,)
    b1_fold = (params["lin1_b"].astype(jnp.float32)[None, :]
               + conv_b[:, None] * s1[None, :]).reshape(1, COUT * H)

    w2t = params["lin2_w"].T.astype(jnp.float32)        # (H, SEQ)
    b2 = params["lin2_b"].astype(jnp.float32).reshape(1, SEQ)
    return a_fold, b1_fold, w2t, b2, COUT, H, SEQ


def dilated_inception_forward(x, params, dilation_factor):
    B, CIN, N, T = x.shape
    D = dilation_factor
    T_OUT = T - D * (KERNEL_SET[-1] - 1)

    a_fold, b1, w2t, b2, COUT, H, SEQ = _fold_params(params, D, CIN, T, T_OUT)

    TN = _choose_tn(N, CIN, T, COUT, SEQ)
    grid = (B, N // TN)

    out = pl.pallas_call(
        _fused_kernel,
        out_shape=jax.ShapeDtypeStruct((B, COUT, N, SEQ), jnp.float32),
        grid_spec=pltpu.PrefetchScalarGridSpec(
            num_scalar_prefetch=0,
            grid=grid,
            in_specs=[
                # x consumed directly in (B, CIN, N, T) layout — no XLA transpose/pad
                pl.BlockSpec((None, CIN, TN, T), lambda b, n: (b, 0, n, 0)),
                pl.BlockSpec((CIN, T, COUT * H), lambda b, n: (0, 0, 0)),   # A_fold
                pl.BlockSpec((1, COUT * H), lambda b, n: (0, 0)),           # B1
                pl.BlockSpec((H, SEQ), lambda b, n: (0, 0)),                # W2^T
                pl.BlockSpec((1, SEQ), lambda b, n: (0, 0)),                # b2
            ],
            # output written directly in final (B, COUT, N, SEQ) layout
            out_specs=pl.BlockSpec((None, COUT, TN, SEQ), lambda b, n: (b, 0, n, 0)),
        ),
        compiler_params=pltpu.CompilerParams(
            dimension_semantics=("parallel", "parallel")),
    )(x.astype(jnp.float32), a_fold, b1, w2t, b2)

    return out   # already (B, COUT, N, SEQ) — no post-kernel reshape/transpose


def init_params(key, cin, cout, dilation_factor, seq_len):
    """Deterministic synthetic parameters matching the PyTorch module's shapes."""
    coutb = cout // len(KERNEL_SET)
    t_out = seq_len - dilation_factor * (KERNEL_SET[-1] - 1)
    keys = jax.random.split(key, 2 * len(KERNEL_SET) + 4)
    conv_w, conv_b = [], []
    for i, kern in enumerate(KERNEL_SET):
        bound = 1.0 / np.sqrt(cin * kern)
        conv_w.append(jax.random.uniform(keys[2 * i], (coutb, cin, kern),
                                         jnp.float32, -bound, bound))
        conv_b.append(jax.random.uniform(keys[2 * i + 1], (coutb,),
                                         jnp.float32, -bound, bound))
    k0 = 2 * len(KERNEL_SET)
    b1 = 1.0 / np.sqrt(t_out)
    lin1_w = jax.random.uniform(keys[k0], (cin, t_out), jnp.float32, -b1, b1)
    lin1_b = jax.random.uniform(keys[k0 + 1], (cin,), jnp.float32, -b1, b1)
    b2 = 1.0 / np.sqrt(cin)
    lin2_w = jax.random.uniform(keys[k0 + 2], (seq_len, cin), jnp.float32, -b2, b2)
    lin2_b = jax.random.uniform(keys[k0 + 3], (seq_len,), jnp.float32, -b2, b2)
    return {"conv_w": conv_w, "conv_b": conv_b,
            "lin1_w": lin1_w, "lin1_b": lin1_b,
            "lin2_w": lin2_w, "lin2_b": lin2_b}


def reference_forward(x, params, dilation_factor):
    """Pure-JAX reproduction of the PyTorch forward (for validation)."""
    B, CIN, N, T = x.shape
    D = dilation_factor
    T_OUT = T - D * (KERNEL_SET[-1] - 1)
    outs = []
    for br, kern in enumerate(KERNEL_SET):
        w = params["conv_w"][br]          # (coutb, cin, kern)
        b = params["conv_b"][br]
        t_k = T - D * (kern - 1)
        y = jnp.zeros((B, w.shape[0], N, t_k), jnp.float32)
        for j in range(kern):
            y = y + jnp.einsum("oc,bcnt->bont", w[:, :, j],
                               x[:, :, :, j * D:j * D + t_k])
        y = y + b[None, :, None, None]
        outs.append(y[..., -T_OUT:])
    xc = jnp.concatenate(outs, axis=1)     # (B, cout, N, T_OUT)
    h = jnp.einsum("bont,pt->bonp", xc, params["lin1_w"]) + params["lin1_b"]
    h = jnp.maximum(h, 0.0)
    out = jnp.einsum("bonp,qp->bonq", h, params["lin2_w"]) + params["lin2_b"]
    return out


if __name__ == "__main__":
    B, CIN, N, SEQ = 2, 4, 16, 16     # input (B, cin, N, T=seq_len), NCHW
    COUT, DIL = 8, 1                  # cout divisible by len(kernel_set)=4

    key = jax.random.PRNGKey(0)
    kx, kp = jax.random.split(key)
    x = jax.random.normal(kx, (B, CIN, N, SEQ), jnp.float32)
    params = init_params(kp, CIN, COUT, DIL, SEQ)

    fwd = jax.jit(lambda xx, pp: dilated_inception_forward(xx, pp, DIL))
    out = jax.block_until_ready(fwd(x, params))
    assert out.shape == (B, COUT, N, SEQ)

    ref = reference_forward(x, params, DIL)
    np.testing.assert_allclose(np.asarray(out), np.asarray(ref),
                               rtol=2e-4, atol=2e-4)
    print("KERNEL_OK")
</pallas_src>

<mosaic_0001>
module attributes {stable_mosaic.version = 11 : i64} {
  func.func @_fused_kernel(%arg0: i32, %arg1: i32, %arg2: memref<1x4x16x16xf32, #tpu.memory_space<vmem>>, %arg3: memref<4x16x32xf32, #tpu.memory_space<vmem>>, %arg4: memref<1x32xf32, #tpu.memory_space<vmem>>, %arg5: memref<4x16xf32, #tpu.memory_space<vmem>>, %arg6: memref<1x16xf32, #tpu.memory_space<vmem>>, %arg7: memref<1x8x16x16xf32, #tpu.memory_space<vmem>>) attributes {dimension_semantics = [#tpu.dimension_semantics<parallel>, #tpu.dimension_semantics<parallel>], iteration_bounds = array<i64: 2, 1>, scalar_prefetch = 0 : i64, scratch_operands = 0 : i64, tpu.core_type = #tpu.core_type<tc>, window_params = [{transform_indices = @transform_0, window_bounds = array<i64: 1, 4, 16, 16>}, {pipeline_mode = #tpu.pipeline_mode<synchronous>, transform_indices = @transform_1, window_bounds = array<i64: 4, 16, 32>}, {pipeline_mode = #tpu.pipeline_mode<synchronous>, transform_indices = @transform_2, window_bounds = array<i64: 1, 32>}, {pipeline_mode = #tpu.pipeline_mode<synchronous>, transform_indices = @transform_3, window_bounds = array<i64: 4, 16>}, {pipeline_mode = #tpu.pipeline_mode<synchronous>, transform_indices = @transform_4, window_bounds = array<i64: 1, 16>}, {transform_indices = @transform_5, window_bounds = array<i64: 1, 8, 16, 16>}]} {
    %c0 = arith.constant 0 : index
    %c0_0 = arith.constant 0 : index
    %c0_1 = arith.constant 0 : index
    %c0_2 = arith.constant 0 : index
    %0 = vector.load %arg2[%c0, %c0_0, %c0_1, %c0_2] : memref<1x4x16x16xf32, #tpu.memory_space<vmem>>, vector<1x1x16x16xf32>
    %1 = vector.shape_cast %0 : vector<1x1x16x16xf32> to vector<16x16xf32>
    %c0_3 = arith.constant 0 : index
    %c0_4 = arith.constant 0 : index
    %c0_5 = arith.constant 0 : index
    %2 = vector.load %arg3[%c0_3, %c0_4, %c0_5] : memref<4x16x32xf32, #tpu.memory_space<vmem>>, vector<1x16x32xf32>
    %3 = vector.shape_cast %2 : vector<1x16x32xf32> to vector<16x32xf32>
    %cst = arith.constant dense<0.000000e+00> : vector<16x32xf32>
    %4 = tpu.matmul %1, %3, %cst {dimension_numbers = #tpu.dot_dimension_numbers<[1], [0], [0], [1], [0, 0, 1, 1], [], []>} : vector<16x16xf32>, vector<16x32xf32>, vector<16x32xf32> -> vector<16x32xf32>
    %c0_6 = arith.constant 0 : index
    %c1 = arith.constant 1 : index
    %c0_7 = arith.constant 0 : index
    %c0_8 = arith.constant 0 : index
    %5 = vector.load %arg2[%c0_6, %c1, %c0_7, %c0_8] : memref<1x4x16x16xf32, #tpu.memory_space<vmem>>, vector<1x1x16x16xf32>
    %6 = vector.shape_cast %5 : vector<1x1x16x16xf32> to vector<16x16xf32>
    %c1_9 = arith.constant 1 : index
    %c0_10 = arith.constant 0 : index
    %c0_11 = arith.constant 0 : index
    %7 = vector.load %arg3[%c1_9, %c0_10, %c0_11] : memref<4x16x32xf32, #tpu.memory_space<vmem>>, vector<1x16x32xf32>
    %8 = vector.shape_cast %7 : vector<1x16x32xf32> to vector<16x32xf32>
    %cst_12 = arith.constant dense<0.000000e+00> : vector<16x32xf32>
    %9 = tpu.matmul %6, %8, %cst_12 {dimension_numbers = #tpu.dot_dimension_numbers<[1], [0], [0], [1], [0, 0, 1, 1], [], []>} : vector<16x16xf32>, vector<16x32xf32>, vector<16x32xf32> -> vector<16x32xf32>
    %10 = arith.addf %4, %9 : vector<16x32xf32>
    %c0_13 = arith.constant 0 : index
    %c2 = arith.constant 2 : index
    %c0_14 = arith.constant 0 : index
    %c0_15 = arith.constant 0 : index
    %11 = vector.load %arg2[%c0_13, %c2, %c0_14, %c0_15] : memref<1x4x16x16xf32, #tpu.memory_space<vmem>>, vector<1x1x16x16xf32>
    %12 = vector.shape_cast %11 : vector<1x1x16x16xf32> to vector<16x16xf32>
    %c2_16 = arith.constant 2 : index
    %c0_17 = arith.constant 0 : index
    %c0_18 = arith.constant 0 : index
    %13 = vector.load %arg3[%c2_16, %c0_17, %c0_18] : memref<4x16x32xf32, #tpu.memory_space<vmem>>, vector<1x16x32xf32>
    %14 = vector.shape_cast %13 : vector<1x16x32xf32> to vector<16x32xf32>
    %cst_19 = arith.constant dense<0.000000e+00> : vector<16x32xf32>
    %15 = tpu.matmul %12, %14, %cst_19 {dimension_numbers = #tpu.dot_dimension_numbers<[1], [0], [0], [1], [0, 0, 1, 1], [], []>} : vector<16x16xf32>, vector<16x32xf32>, vector<16x32xf32> -> vector<16x32xf32>
    %16 = arith.addf %10, %15 : vector<16x32xf32>
    %c0_20 = arith.constant 0 : index
    %c3 = arith.constant 3 : index
    %c0_21 = arith.constant 0 : index
    %c0_22 = arith.constant 0 : index
    %17 = vector.load %arg2[%c0_20, %c3, %c0_21, %c0_22] : memref<1x4x16x16xf32, #tpu.memory_space<vmem>>, vector<1x1x16x16xf32>
    %18 = vector.shape_cast %17 : vector<1x1x16x16xf32> to vector<16x16xf32>
    %c3_23 = arith.constant 3 : index
    %c0_24 = arith.constant 0 : index
    %c0_25 = arith.constant 0 : index
    %19 = vector.load %arg3[%c3_23, %c0_24, %c0_25] : memref<4x16x32xf32, #tpu.memory_space<vmem>>, vector<1x16x32xf32>
    %20 = vector.shape_cast %19 : vector<1x16x32xf32> to vector<16x32xf32>
    %cst_26 = arith.constant dense<0.000000e+00> : vector<16x32xf32>
    %21 = tpu.matmul %18, %20, %cst_26 {dimension_numbers = #tpu.dot_dimension_numbers<[1], [0], [0], [1], [0, 0, 1, 1], [], []>} : vector<16x16xf32>, vector<16x32xf32>, vector<16x32xf32> -> vector<16x32xf32>
    %22 = arith.addf %16, %21 : vector<16x32xf32>
    %c0_27 = arith.constant 0 : index
    %c0_28 = arith.constant 0 : index
    %23 = vector.load %arg4[%c0_27, %c0_28] : memref<1x32xf32, #tpu.memory_space<vmem>>, vector<1x32xf32>
    %24 = vector.broadcast %23 : vector<1x32xf32> to vector<16x32xf32>
    %25 = arith.addf %22, %24 : vector<16x32xf32>
    %cst_29 = arith.constant 0.000000e+00 : f32
    %26 = vector.broadcast %cst_29 : f32 to vector<16x32xf32>
    %27 = arith.maximumf %25, %26 : vector<16x32xf32>
    %28 = vector.extract_strided_slice %27 {offsets = [0, 0], sizes = [16, 4], strides = [1, 1]} : vector<16x32xf32> to vector<16x4xf32>
    %c0_30 = arith.constant 0 : index
    %c0_31 = arith.constant 0 : index
    %29 = vector.load %arg5[%c0_30, %c0_31] : memref<4x16xf32, #tpu.memory_space<vmem>>, vector<4x16xf32>
    %cst_32 = arith.constant dense<0.000000e+00> : vector<16x16xf32>
    %30 = tpu.matmul %28, %29, %cst_32 {dimension_numbers = #tpu.dot_dimension_numbers<[1], [0], [0], [1], [0, 0, 1, 1], [], []>} : vector<16x4xf32>, vector<4x16xf32>, vector<16x16xf32> -> vector<16x16xf32>
    %c0_33 = arith.constant 0 : index
    %c0_34 = arith.constant 0 : index
    %31 = vector.load %arg6[%c0_33, %c0_34] : memref<1x16xf32, #tpu.memory_space<vmem>>, vector<1x16xf32>
    %32 = vector.broadcast %31 : vector<1x16xf32> to vector<16x16xf32>
    %33 = arith.addf %30, %32 : vector<16x16xf32>
    %c0_35 = arith.constant 0 : index
    %c0_36 = arith.constant 0 : index
    %c0_37 = arith.constant 0 : index
    %c0_38 = arith.constant 0 : index
    %34 = vector.load %arg7[%c0_35, %c0_36, %c0_37, %c0_38] : memref<1x8x16x16xf32, #tpu.memory_space<vmem>>, vector<1x1x16x16xf32>
    %35 = vector.shape_cast %34 : vector<1x1x16x16xf32> to vector<16x16xf32>
    %36 = vector.shape_cast %33 : vector<16x16xf32> to vector<1x1x16x16xf32>
    tpu.vector_store %arg7[%c0_35, %c0_36, %c0_37, %c0_38], %36 {strides = array<i32>} : memref<1x8x16x16xf32, #tpu.memory_space<vmem>>, vector<1x1x16x16xf32>,
    %37 = vector.extract_strided_slice %27 {offsets = [0, 4], sizes = [16, 4], strides = [1, 1]} : vector<16x32xf32> to vector<16x4xf32>
    %c0_39 = arith.constant 0 : index
    %c0_40 = arith.constant 0 : index
    %38 = vector.load %arg5[%c0_39, %c0_40] : memref<4x16xf32, #tpu.memory_space<vmem>>, vector<4x16xf32>
    %cst_41 = arith.constant dense<0.000000e+00> : vector<16x16xf32>
    %39 = tpu.matmul %37, %38, %cst_41 {dimension_numbers = #tpu.dot_dimension_numbers<[1], [0], [0], [1], [0, 0, 1, 1], [], []>} : vector<16x4xf32>, vector<4x16xf32>, vector<16x16xf32> -> vector<16x16xf32>
    %c0_42 = arith.constant 0 : index
    %c0_43 = arith.constant 0 : index
    %40 = vector.load %arg6[%c0_42, %c0_43] : memref<1x16xf32, #tpu.memory_space<vmem>>, vector<1x16xf32>
    %41 = vector.broadcast %40 : vector<1x16xf32> to vector<16x16xf32>
    %42 = arith.addf %39, %41 : vector<16x16xf32>
    %c0_44 = arith.constant 0 : index
    %c1_45 = arith.constant 1 : index
    %c0_46 = arith.constant 0 : index
    %c0_47 = arith.constant 0 : index
    %43 = vector.load %arg7[%c0_44, %c1_45, %c0_46, %c0_47] : memref<1x8x16x16xf32, #tpu.memory_space<vmem>>, vector<1x1x16x16xf32>
    %44 = vector.shape_cast %43 : vector<1x1x16x16xf32> to vector<16x16xf32>
    %45 = vector.shape_cast %42 : vector<16x16xf32> to vector<1x1x16x16xf32>
    tpu.vector_store %arg7[%c0_44, %c1_45, %c0_46, %c0_47], %45 {strides = array<i32>} : memref<1x8x16x16xf32, #tpu.memory_space<vmem>>, vector<1x1x16x16xf32>,
    %46 = vector.extract_strided_slice %27 {offsets = [0, 8], sizes = [16, 4], strides = [1, 1]} : vector<16x32xf32> to vector<16x4xf32>
    %c0_48 = arith.constant 0 : index
    %c0_49 = arith.constant 0 : index
    %47 = vector.load %arg5[%c0_48, %c0_49] : memref<4x16xf32, #tpu.memory_space<vmem>>, vector<4x16xf32>
    %cst_50 = arith.constant dense<0.000000e+00> : vector<16x16xf32>
    %48 = tpu.matmul %46, %47, %cst_50 {dimension_numbers = #tpu.dot_dimension_numbers<[1], [0], [0], [1], [0, 0, 1, 1], [], []>} : vector<16x4xf32>, vector<4x16xf32>, vector<16x16xf32> -> vector<16x16xf32>
    %c0_51 = arith.constant 0 : index
    %c0_52 = arith.constant 0 : index
    %49 = vector.load %arg6[%c0_51, %c0_52] : memref<1x16xf32, #tpu.memory_space<vmem>>, vector<1x16xf32>
    %50 = vector.broadcast %49 : vector<1x16xf32> to vector<16x16xf32>
    %51 = arith.addf %48, %50 : vector<16x16xf32>
    %c0_53 = arith.constant 0 : index
    %c2_54 = arith.constant 2 : index
    %c0_55 = arith.constant 0 : index
    %c0_56 = arith.constant 0 : index
    %52 = vector.load %arg7[%c0_53, %c2_54, %c0_55, %c0_56] : memref<1x8x16x16xf32, #tpu.memory_space<vmem>>, vector<1x1x16x16xf32>
    %53 = vector.shape_cast %52 : vector<1x1x16x16xf32> to vector<16x16xf32>
    %54 = vector.shape_cast %51 : vector<16x16xf32> to vector<1x1x16x16xf32>
    tpu.vector_store %arg7[%c0_53, %c2_54, %c0_55, %c0_56], %54 {strides = array<i32>} : memref<1x8x16x16xf32, #tpu.memory_space<vmem>>, vector<1x1x16x16xf32>,
    %55 = vector.extract_strided_slice %27 {offsets = [0, 12], sizes = [16, 4], strides = [1, 1]} : vector<16x32xf32> to vector<16x4xf32>
    %c0_57 = arith.constant 0 : index
    %c0_58 = arith.constant 0 : index
    %56 = vector.load %arg5[%c0_57, %c0_58] : memref<4x16xf32, #tpu.memory_space<vmem>>, vector<4x16xf32>
    %cst_59 = arith.constant dense<0.000000e+00> : vector<16x16xf32>
    %57 = tpu.matmul %55, %56, %cst_59 {dimension_numbers = #tpu.dot_dimension_numbers<[1], [0], [0], [1], [0, 0, 1, 1], [], []>} : vector<16x4xf32>, vector<4x16xf32>, vector<16x16xf32> -> vector<16x16xf32>
    %c0_60 = arith.constant 0 : index
    %c0_61 = arith.constant 0 : index
    %58 = vector.load %arg6[%c0_60, %c0_61] : memref<1x16xf32, #tpu.memory_space<vmem>>, vector<1x16xf32>
    %59 = vector.broadcast %58 : vector<1x16xf32> to vector<16x16xf32>
    %60 = arith.addf %57, %59 : vector<16x16xf32>
    %c0_62 = arith.constant 0 : index
    %c3_63 = arith.constant 3 : index
    %c0_64 = arith.constant 0 : index
    %c0_65 = arith.constant 0 : index
    %61 = vector.load %arg7[%c0_62, %c3_63, %c0_64, %c0_65] : memref<1x8x16x16xf32, #tpu.memory_space<vmem>>, vector<1x1x16x16xf32>
    %62 = vector.shape_cast %61 : vector<1x1x16x16xf32> to vector<16x16xf32>
    %63 = vector.shape_cast %60 : vector<16x16xf32> to vector<1x1x16x16xf32>
    tpu.vector_store %arg7[%c0_62, %c3_63, %c0_64, %c0_65], %63 {strides = array<i32>} : memref<1x8x16x16xf32, #tpu.memory_space<vmem>>, vector<1x1x16x16xf32>,
    %64 = vector.extract_strided_slice %27 {offsets = [0, 16], sizes = [16, 4], strides = [1, 1]} : vector<16x32xf32> to vector<16x4xf32>
    %c0_66 = arith.constant 0 : index
    %c0_67 = arith.constant 0 : index
    %65 = vector.load %arg5[%c0_66, %c0_67] : memref<4x16xf32, #tpu.memory_space<vmem>>, vector<4x16xf32>
    %cst_68 = arith.constant dense<0.000000e+00> : vector<16x16xf32>
    %66 = tpu.matmul %64, %65, %cst_68 {dimension_numbers = #tpu.dot_dimension_numbers<[1], [0], [0], [1], [0, 0, 1, 1], [], []>} : vector<16x4xf32>, vector<4x16xf32>, vector<16x16xf32> -> vector<16x16xf32>
    %c0_69 = arith.constant 0 : index
    %c0_70 = arith.constant 0 : index
    %67 = vector.load %arg6[%c0_69, %c0_70] : memref<1x16xf32, #tpu.memory_space<vmem>>, vector<1x16xf32>
    %68 = vector.broadcast %67 : vector<1x16xf32> to vector<16x16xf32>
    %69 = arith.addf %66, %68 : vector<16x16xf32>
    %c0_71 = arith.constant 0 : index
    %c4 = arith.constant 4 : index
    %c0_72 = arith.constant 0 : index
    %c0_73 = arith.constant 0 : index
    %70 = vector.load %arg7[%c0_71, %c4, %c0_72, %c0_73] : memref<1x8x16x16xf32, #tpu.memory_space<vmem>>, vector<1x1x16x16xf32>
    %71 = vector.shape_cast %70 : vector<1x1x16x16xf32> to vector<16x16xf32>
    %72 = vector.shape_cast %69 : vector<16x16xf32> to vector<1x1x16x16xf32>
    tpu.vector_store %arg7[%c0_71, %c4, %c0_72, %c0_73], %72 {strides = array<i32>} : memref<1x8x16x16xf32, #tpu.memory_space<vmem>>, vector<1x1x16x16xf32>,
    %73 = vector.extract_strided_slice %27 {offsets = [0, 20], sizes = [16, 4], strides = [1, 1]} : vector<16x32xf32> to vector<16x4xf32>
    %c0_74 = arith.constant 0 : index
    %c0_75 = arith.constant 0 : index
    %74 = vector.load %arg5[%c0_74, %c0_75] : memref<4x16xf32, #tpu.memory_space<vmem>>, vector<4x16xf32>
    %cst_76 = arith.constant dense<0.000000e+00> : vector<16x16xf32>
    %75 = tpu.matmul %73, %74, %cst_76 {dimension_numbers = #tpu.dot_dimension_numbers<[1], [0], [0], [1], [0, 0, 1, 1], [], []>} : vector<16x4xf32>, vector<4x16xf32>, vector<16x16xf32> -> vector<16x16xf32>
    %c0_77 = arith.constant 0 : index
    %c0_78 = arith.constant 0 : index
    %76 = vector.load %arg6[%c0_77, %c0_78] : memref<1x16xf32, #tpu.memory_space<vmem>>, vector<1x16xf32>
    %77 = vector.broadcast %76 : vector<1x16xf32> to vector<16x16xf32>
    %78 = arith.addf %75, %77 : vector<16x16xf32>
    %c0_79 = arith.constant 0 : index
    %c5 = arith.constant 5 : index
    %c0_80 = arith.constant 0 : index
    %c0_81 = arith.constant 0 : index
    %79 = vector.load %arg7[%c0_79, %c5, %c0_80, %c0_81] : memref<1x8x16x16xf32, #tpu.memory_space<vmem>>, vector<1x1x16x16xf32>
    %80 = vector.shape_cast %79 : vector<1x1x16x16xf32> to vector<16x16xf32>
    %81 = vector.shape_cast %78 : vector<16x16xf32> to vector<1x1x16x16xf32>
    tpu.vector_store %arg7[%c0_79, %c5, %c0_80, %c0_81], %81 {strides = array<i32>} : memref<1x8x16x16xf32, #tpu.memory_space<vmem>>, vector<1x1x16x16xf32>,
    %82 = vector.extract_strided_slice %27 {offsets = [0, 24], sizes = [16, 4], strides = [1, 1]} : vector<16x32xf32> to vector<16x4xf32>
    %c0_82 = arith.constant 0 : index
    %c0_83 = arith.constant 0 : index
    %83 = vector.load %arg5[%c0_82, %c0_83] : memref<4x16xf32, #tpu.memory_space<vmem>>, vector<4x16xf32>
    %cst_84 = arith.constant dense<0.000000e+00> : vector<16x16xf32>
    %84 = tpu.matmul %82, %83, %cst_84 {dimension_numbers = #tpu.dot_dimension_numbers<[1], [0], [0], [1], [0, 0, 1, 1], [], []>} : vector<16x4xf32>, vector<4x16xf32>, vector<16x16xf32> -> vector<16x16xf32>
    %c0_85 = arith.constant 0 : index
    %c0_86 = arith.constant 0 : index
    %85 = vector.load %arg6[%c0_85, %c0_86] : memref<1x16xf32, #tpu.memory_space<vmem>>, vector<1x16xf32>
    %86 = vector.broadcast %85 : vector<1x16xf32> to vector<16x16xf32>
    %87 = arith.addf %84, %86 : vector<16x16xf32>
    %c0_87 = arith.constant 0 : index
    %c6 = arith.constant 6 : index
    %c0_88 = arith.constant 0 : index
    %c0_89 = arith.constant 0 : index
    %88 = vector.load %arg7[%c0_87, %c6, %c0_88, %c0_89] : memref<1x8x16x16xf32, #tpu.memory_space<vmem>>, vector<1x1x16x16xf32>
    %89 = vector.shape_cast %88 : vector<1x1x16x16xf32> to vector<16x16xf32>
    %90 = vector.shape_cast %87 : vector<16x16xf32> to vector<1x1x16x16xf32>
    tpu.vector_store %arg7[%c0_87, %c6, %c0_88, %c0_89], %90 {strides = array<i32>} : memref<1x8x16x16xf32, #tpu.memory_space<vmem>>, vector<1x1x16x16xf32>,
    %91 = vector.extract_strided_slice %27 {offsets = [0, 28], sizes = [16, 4], strides = [1, 1]} : vector<16x32xf32> to vector<16x4xf32>
    %c0_90 = arith.constant 0 : index
    %c0_91 = arith.constant 0 : index
    %92 = vector.load %arg5[%c0_90, %c0_91] : memref<4x16xf32, #tpu.memory_space<vmem>>, vector<4x16xf32>
    %cst_92 = arith.constant dense<0.000000e+00> : vector<16x16xf32>
    %93 = tpu.matmul %91, %92, %cst_92 {dimension_numbers = #tpu.dot_dimension_numbers<[1], [0], [0], [1], [0, 0, 1, 1], [], []>} : vector<16x4xf32>, vector<4x16xf32>, vector<16x16xf32> -> vector<16x16xf32>
    %c0_93 = arith.constant 0 : index
    %c0_94 = arith.constant 0 : index
    %94 = vector.load %arg6[%c0_93, %c0_94] : memref<1x16xf32, #tpu.memory_space<vmem>>, vector<1x16xf32>
    %95 = vector.broadcast %94 : vector<1x16xf32> to vector<16x16xf32>
    %96 = arith.addf %93, %95 : vector<16x16xf32>
    %c0_95 = arith.constant 0 : index
    %c7 = arith.constant 7 : index
    %c0_96 = arith.constant 0 : index
    %c0_97 = arith.constant 0 : index
    %97 = vector.load %arg7[%c0_95, %c7, %c0_96, %c0_97] : memref<1x8x16x16xf32, #tpu.memory_space<vmem>>, vector<1x1x16x16xf32>
    %98 = vector.shape_cast %97 : vector<1x1x16x16xf32> to vector<16x16xf32>
    %99 = vector.shape_cast %96 : vector<16x16xf32> to vector<1x1x16x16xf32>
    tpu.vector_store %arg7[%c0_95, %c7, %c0_96, %c0_97], %99 {strides = array<i32>} : memref<1x8x16x16xf32, #tpu.memory_space<vmem>>, vector<1x1x16x16xf32>,
    return
  }
  func.func @transform_0(%arg0: i32, %arg1: i32) -> (i32, i32, i32, i32) {
    %c0_i32 = arith.constant 0 : i32
    %c0_i32_0 = arith.constant 0 : i32
    %c0_i32_1 = arith.constant 0 : i32
    return %arg0, %c0_i32, %arg1, %c0_i32_0 : i32, i32, i32, i32
  }
  func.func @transform_1(%arg0: i32, %arg1: i32) -> (i32, i32, i32) {
    %c0_i32 = arith.constant 0 : i32
    %c0_i32_0 = arith.constant 0 : i32
    %c0_i32_1 = arith.constant 0 : i32
    %c0_i32_2 = arith.constant 0 : i32
    return %c0_i32, %c0_i32_0, %c0_i32_1 : i32, i32, i32
  }
  func.func @transform_2(%arg0: i32, %arg1: i32) -> (i32, i32) {
    %c0_i32 = arith.constant 0 : i32
    %c0_i32_0 = arith.constant 0 : i32
    %c0_i32_1 = arith.constant 0 : i32
    return %c0_i32, %c0_i32_0 : i32, i32
  }
  func.func @transform_3(%arg0: i32, %arg1: i32) -> (i32, i32) {
    %c0_i32 = arith.constant 0 : i32
    %c0_i32_0 = arith.constant 0 : i32
    %c0_i32_1 = arith.constant 0 : i32
    return %c0_i32, %c0_i32_0 : i32, i32
  }
  func.func @transform_4(%arg0: i32, %arg1: i32) -> (i32, i32) {
    %c0_i32 = arith.constant 0 : i32
    %c0_i32_0 = arith.constant 0 : i32
    %c0_i32_1 = arith.constant 0 : i32
    return %c0_i32, %c0_i32_0 : i32, i32
  }
  func.func @transform_5(%arg0: i32, %arg1: i32) -> (i32, i32, i32, i32) {
    %c0_i32 = arith.constant 0 : i32
    %c0_i32_0 = arith.constant 0 : i32
    %c0_i32_1 = arith.constant 0 : i32
    return %arg0, %c0_i32, %arg1, %c0_i32_0 : i32, i32, i32, i32
  }
}

</mosaic_0001>

<bundles_post_ra>
// kernel: _lambda_.1
= control target key start
LH: loop header
LB: loop body
LE: loop exit
PB: predicated region body
PF: predicated region fallthrough
CT: control target
= control target key end

     0   :  { %10 = vsyncpa [#allocation3], 0  ;;  %s2130_s0 = inlined_call_operand.vmem [shape: f32[2,4,16,16], index: 0, kind: input, shape index: {}]   ;;  %s2131_s1 = inlined_call_operand.vmem [shape: f32[4,16,32], index: 1, kind: input, shape index: {}]   ;;  %s2132_s2 = inlined_call_operand.vmem [shape: f32[1,32], index: 2, kind: input, shape index: {}]   ;;  %s2133_s3 = inlined_call_operand.vmem [shape: f32[4,16], index: 3, kind: input, shape index: {}]   ;;  %s2134_s4 = inlined_call_operand.vmem [shape: f32[1,16], index: 4, kind: input, shape index: {}]   ;;  %s2135_s5 = inlined_call_operand.hbm [shape: f32[2,8,16,16], index: 5, kind: output, shape index: {}]  }
   0x1   :  { %12 = vsyncpa [#allocation3 + $0x1], 0  ;;  %s1882_s18 = smov 0   ;;  %s1884_s19 = smov 0  }
   0x2   :  { %s1886_s20 = smov 0   ;;  %s1888_s21 = smov 0  }
   0x3   :  { %s1890_s22 = smov 0   ;;  %s1892_s23 = smov 0  }
   0x4 LB: > { %s1486_s24 = sadd.s32 4294967295, %s1840_s23   ;;  %s1487_s25 = sadd.s32 4294967294, %s1840_s23   ;;  %s1840_s23 = sphi %s1892_s23, %s18_s23   ;;  %s1836_s22 = sphi %s1890_s22, %s2142_s22   ;;  %s1832_s21 = sphi %s1888_s21, %s2141_s21   ;;  %s1828_s20 = sphi %s1886_s20, %s2140_s20   ;;  %s1824_s19 = sphi %s1884_s19, %s2139_s19   ;;  %s1820_s18 = sphi %s1882_s18, %s2138_s18  }
   0x5   : > { %s30_s26 = sadd.s32 1, %s1836_s22  ;;  %s151_s27 = sadd.s32 1, %s1828_s20 }
   0x6   : > { %p32_p0 = scmp.ge.s32.totalorder %s30_s26, 2  ;;  %p161_p1 = scmp.ne.s32.totalorder %s1828_s20, %s1824_s19 }
   0x7   : > { %p162_p2 = scmp.eq.s32.totalorder %s1486_s24, 1  ;;  %p167_p3 = scmp.ne.s32.totalorder %s1824_s19, %s1820_s18 }
   0x8   : > { %s2144_s26 = smov (%p32_p0, %s30_s26), 0  ;;  %p168_p5 = scmp.eq.s32.totalorder %s1487_s25, 1 }
   0x9   : > { %p1922_p4 = por %p162_p2, %p161_p1  ;;  %s146_s29 = ssub.s32 %s1836_s22, %s2144_s26 }
   0xa   : > { %p1490_p6 = scmp.ge.s32.totalorder %s1840_s23, 1  ;;  %p149_p7 = scmp.eq.s32.totalorder %s146_s29, 0 }
   0xb   : > { %p1929_p8 = por %p168_p5, %p167_p3  ;;  %p211_p9 = scmp.lt.s32.totalorder %s1840_s23, 3 }
   0xc   : > { %s1935_s6 = scalar_select %p149_p7, %s1828_s20, %s151_s27  }
   0xd   : > { %p212_p10 = pnand %p1490_p6, %p211_p9 }
   0xe   : > { %v1496_v0 = vld [vmem:[%s2131_s1 + $0x10] sm:$0xff] (!%p212_p10)  ;;  %v1497_v1 = vld [vmem:[%s2131_s1 + $0x18] sm:$0xff] (!%p212_p10)  ;;  %p244_p11 = scmp.lt.s32.totalorder (!%p212_p10), %s1832_s21, 1  ;;  %v256_v2 = vld [vmem:[%s2131_s1] sm:$0xff] (!%p212_p10)  ;;  %vm264_vm0 = vcmask (!%p212_p10), 130048   ;;  %vm631_vm1 = vcmask (!%p212_p10), 1043456  }
   0xf   : > { %215 = sbr.rel (%p212_p10) target bundleno = 637 (0x27d), region = 40  ;;  %v1676_v3 = vpack.c.bf16 (!%p212_p10), %v1497_v1, %v1496_v0  ;;  %v257_v4 = vld [vmem:[%s2131_s1 + $0x8] sm:$0xff] (!%p212_p10)  ;;  %v1504_v6 = vld [vmem:[%s2131_s1 + $0x20] sm:$0xff] (!%p212_p10)  ;;  %v1510_v12 = vld [vmem:[%s2131_s1 + $0x30] sm:$0xff] (!%p212_p10)  ;;  %vm624_vm2 = vcmask (!%p212_p10), 31744   ;;  %s1842_s25 = smov (!%p212_p10), 120  }
  0x10   : > { %v1680_v5 = vpack.c.bf16 (!%p212_p10), %v257_v4, %v256_v2  ;;  %v1505_v7 = vld [vmem:[%s2131_s1 + $0x28] sm:$0xff] (!%p212_p10)  ;;  %v1511_v13 = vld [vmem:[%s2131_s1 + $0x38] sm:$0xff] (!%p212_p10)  ;;  %v616_v20 = vld [vmem:[%s2133_s3] sm:$0xf] (!%p212_p10)  ;;  %s1844_s10 = smov (!%p212_p10), 116   ;;  %s1845_s13 = smov (!%p212_p10), 112  }
  0x11   : > { %1677 = vmatprep.subr.bf16.mxu0 (!%p212_p10), %v1676_v3  ;;  %v1684_v11 = vpack.c.bf16 (!%p212_p10), %v1505_v7, %v1504_v6  ;;  %v1688_v16 = vpack.c.bf16 (!%p212_p10), %v1511_v13, %v1510_v12  ;;  %1636 = vmatprep.subr.msk.mxu1 (!%p212_p10), %vm631_vm1, %v616_v20  ;;  %v712_v21 = vld [vmem:[%s2133_s3] sm:$0xf] (!%p212_p10)  ;;  %s1846_s14 = smov (!%p212_p10), 108   ;;  %s1848_s16 = smov (!%p212_p10), 104  }
  0x12   : > { %1679 = vmatpush3.bf16.msra.mxu0 (!%p212_p10), %v1676_v3  ;;  %1637 = vmatpush3.msk.msra.mxu1 (!%p212_p10), %vm631_vm1, %v616_v20  ;;  %v1514_v22 = vld [vmem:[%s2132_s2] ss:$0 sm:$0xff] (!%p212_p10) }
  0x13   : > { %1681 = vmatprep.subr.bf16.mxu0 (!%p212_p10), %v1680_v5  ;;  %1641 = vmatprep.subr.msk.mxu1 (!%p212_p10), %vm631_vm1, %v712_v21  ;;  %v1100_v29 = vld [vmem:[%s2133_s3] sm:$0xf] (!%p212_p10) }
  0x14   : > { %v809_v30 = vld [vmem:[%s2133_s3] sm:$0xf] (!%p212_p10) }
  0x15   : > { %v1294_v31 = vld [vmem:[%s2133_s3] sm:$0xf] (!%p212_p10) }
  0x16   : > { %s245_s15 = scalar_select %p244_p11, %s1832_s21, 1  ;;  %v906_v36 = vld [vmem:[%s2133_s3] sm:$0xf] }
  0x17   : > { %v1003_v39 = vld [vmem:[%s2133_s3] sm:$0xf] }
  0x18   : > { %s1566_s27 = sshll.u32 %s245_s15, 6  ;;  %s1847_s15 = smov 100   ;;  %v1197_v42 = vld [vmem:[%s2133_s3] sm:$0xf] }
  0x19   : > { %s251_s8 = scalar_lea.vmem %s2130_s0, %s1566_s27  ;;  %s1843_s27 = smov 124   ;;  %v1515_v49 = vld [vmem:[%s2134_s4] ss:$0 sm:$0xff] }
  0x1a   : > { %v1494_v8 = vld [vmem:[%s251_s8 + $0x10] sm:$0xff]  ;;  %v1495_v9 = vld [vmem:[%s251_s8 + $0x18] sm:$0xff]  ;;  %v254_v10 = vld [vmem:[%s251_s8] sm:$0xff] }
  0x1b   : > { %1612 = vmatprep.mubr.msk.f32.mxu0 %vm264_vm0, %v1494_v8  ;;  %v255_v14 = vld [vmem:[%s251_s8 + $0x8] sm:$0xff]  ;;  %v1502_v15 = vld [vmem:[%s251_s8 + $0x20] sm:$0xff]  ;;  %v1508_v18 = vld [vmem:[%s251_s8 + $0x30] sm:$0xff] }
  0x1c   : > { %1613 = vmatmul.mubr.msk.f32.vlgmr.msra.gmra.mrb[0].mxu0 %vm264_vm0, %v1495_v9  ;;  %v1503_v17 = vld [vmem:[%s251_s8 + $0x28] sm:$0xff]  ;;  %v1509_v19 = vld [vmem:[%s251_s8 + $0x38] sm:$0xff]  ;;  %s240_s8 = sand.u32 1, %s1824_s19  }
  0x1d   : > { %1683 = vmatpush3.bf16.msra.mxu0 %v1680_v5  ;;  %1619 = vmatprep.mubr.msk.f32.mxu0 %vm264_vm0, %v254_v10  ;;  %s1491_s9 = sshll.u32 %s240_s8, 7 }
  0x1e   : > { %1685 = vmatprep.subr.bf16.mxu0 %v1684_v11  ;;  %s2039_s12 = scalar_lea.vmem [#allocation2], %s1491_s9 }
  0x24   : > { %1620 = vmatmul.mubr.msk.f32.vlgmr.msra.gmra.mrb[0].mxu0 %vm264_vm0, %v255_v14 }
  0x25   : > { %1687 = vmatpush3.bf16.msra.mxu0 %v1684_v11  ;;  %1626 = vmatprep.mubr.msk.f32.mxu0 %vm264_vm0, %v1502_v15 }
  0x26   : > { %1689 = vmatprep.subr.bf16.mxu0 %v1688_v16 }
  0x2c   : > { %1627 = vmatmul.mubr.msk.f32.vlgmr.msra.gmra.mrb[0].mxu0 %vm264_vm0, %v1503_v17 }
  0x2d   : > { %1691 = vmatpush3.bf16.msra.mxu0 %v1688_v16  ;;  %1633 = vmatprep.mubr.msk.f32.mxu0 %vm264_vm0, %v1508_v18 }
  0x2e   : > { %1661 = vmatprep.subr.msk.mxu0 %vm631_vm1, %v1100_v29 }
  0x34   : > { %1634 = vmatmul.mubr.msk.f32.vlgmr.msra.gmra.mrb[0].mxu0 %vm264_vm0, %v1509_v19 }
  0x35   : > { %1662 = vmatpush3.msk.msra.mxu0 %vm631_vm1, %v1100_v29 }
  0x36   : > { %1671 = vmatprep.subr.msk.mxu0 %vm631_vm1, %v1294_v31 }
 0x107   : > { %v1635_v23 = vpop.f32.mrb[0].mxu0 }
 0x108   : > { %v613_v24 = vadd.f32 %v1635_v23, %v1514_v22  ;;  %v594_v25 = vpop.f32.mrb[1].mxu0 }
 0x109   : > { %v612_v26 = vadd.f32 %v1514_v22, %v594_v25 }
 0x10a   : > { %v615_v27 = vmax.f32 %v613_v24, 0.0 }
 0x10b   : > { %v614_v28 = vmax.f32 %v612_v26, 0.0 }
 0x10c   : > { %819 = vrot.lane.b32.xlu1 %v615_v27, %s1842_s25  ;;  %722 = vrot.lane.b32.xlu0 %v615_v27, %s1843_s27 }
 0x10d   : > { %1638 = vmatprep.mubr.msk.f32.mxu1 %vm624_vm2, %v614_v28 }
 0x10e   : > { %1639 = vmatmul.mubr.msk.f32.vlgmr.msra.gmra.mrb[0].mxu1 %vm624_vm2, %v615_v27 }
 0x10f   : > { %1642 = vmatpush3.msk.msra.mxu1 %vm631_vm1, %v712_v21 }
 0x110   : > { %916 = vrot.lane.b32.xlu1 %v615_v27, %s1844_s10  ;;  %720 = vrot.lane.b32.xlu0 %v614_v28, %s1843_s27 }
 0x111   : > { %1646 = vmatprep.subr.msk.mxu1 %vm631_vm1, %v809_v30 }
 0x114   : > { %817 = vrot.lane.b32.xlu1 %v614_v28, %s1842_s25  ;;  %1013 = vrot.lane.b32.xlu0 %v615_v27, %s1845_s13  ;;  %s1849_s25 = smov [#allocation2]  }
 0x115   : > { %s1766_s27 = sshll.u32 %s1849_s25, 4  ;;  %s1767_s27 = int_to_ptr.vmem [resolvable:$false] %s1766_s27 }
 0x116   : > { %s1768_s29 = scalar_lea.vmem %s1767_s27, 4096 }
 0x118   : > { %1110 = vrot.lane.b32.xlu1 %v615_v27, %s1846_s14  ;;  %914 = vrot.lane.b32.xlu0 %v614_v28, %s1844_s10 }
 0x11c   : > { %1108 = vrot.lane.b32.xlu1 %v614_v28, %s1846_s14  ;;  %1011 = vrot.lane.b32.xlu0 %v614_v28, %s1845_s13  ;;  %s1567_s13 = sshll.u32 %s1832_s21, 11  ;;  %s1407_s14 = sshll.u32 %s2039_s12, 4  ;;  %s2072_s14 = int_to_ptr.vmem [resolvable:$true] %s1407_s14 }
 0x11d   : > { %s2070_s17 = scalar_lea.hbm %s2135_s5, %s1567_s13  ;;  %s2084_s21 = scalar_lea.sflag [#allocation3], %s240_s8 }
 0x11e   : > { %s1762_s24 = scalar_lea.vmem %s2072_s14, 2048  ;;  %p1769_p1 = scmp.lt.s32.totalorder %s2072_s14, %s1767_s27 }
 0x11f   : > { %p1763_p12 = scmp.ne.s32.totalorder %s2072_s14, %s1762_s24  ;;  %p1770_p2 = scmp.lt.s32.totalorder %s1768_s29, %s1762_s24 }
 0x120   : > { %1302 = vrot.lane.b32.xlu1 %v614_v28, %s1847_s15  ;;  %1205 = vrot.lane.b32.xlu0 %v614_v28, %s1848_s16 }
 0x121   : > { %p1764_p13 = pnand %p1763_p12, %p1922_p4  ;;  %p1771_p3 = por %p1770_p2, %p1769_p1 }
 0x123   : > { %p1765_p0 = pneg %p1764_p13 }
 0x124   : > { %1304 = vrot.lane.b32.xlu1 %v615_v27, %s1847_s15  ;;  %1207 = vrot.lane.b32.xlu0 %v615_v27, %s1848_s16 }
 0x125   : > { %p1772_p5 = pnand %p1771_p3, %p1765_p0 }
 0x17e   : > { %v820_v32 = vpop.permute.xlu1 %819  ;;  %v723_v33 = vpop.permute.xlu0 %722 }
 0x182   : > { %v917_v34 = vpop.permute.xlu1 %916  ;;  %v721_v35 = vpop.permute.xlu0 %720 }
 0x183   : > { %1643 = vmatprep.mubr.msk.f32.mxu1 %vm624_vm2, %v721_v35 }
 0x184   : > { %1644 = vmatmul.mubr.msk.f32.vlgmr.msra.gmra.mrb[2].mxu1 %vm624_vm2, %v723_v33 }
 0x185   : > { %1647 = vmatpush3.msk.msra.mxu1 %vm631_vm1, %v809_v30 }
 0x186   : > { %v818_v37 = vpop.permute.xlu1 %817  ;;  %v1014_v38 = vpop.permute.xlu0 %1013  ;;  %1651 = vmatprep.subr.msk.mxu1 %vm631_vm1, %v906_v36 }
 0x187   : > { %1648 = vmatprep.mubr.msk.f32.mxu1 %vm624_vm2, %v818_v37 }
 0x188   : > { %1649 = vmatmul.mubr.msk.f32.vlgmr.msra.gmra.mrb[4].mxu1 %vm624_vm2, %v820_v32 }
 0x189   : > { %1652 = vmatpush3.msk.msra.mxu1 %vm631_vm1, %v906_v36 }
 0x18a   : > { %v1111_v40 = vpop.permute.xlu1 %1110  ;;  %v915_v41 = vpop.permute.xlu0 %914  ;;  %1656 = vmatprep.subr.msk.mxu1 %vm631_vm1, %v1003_v39 }
 0x18b   : > { %1653 = vmatprep.mubr.msk.f32.mxu1 %vm624_vm2, %v915_v41 }
 0x18c   : > { %1654 = vmatmul.mubr.msk.f32.vlgmr.msra.gmra.mrb[6].mxu1 %vm624_vm2, %v917_v34 }
 0x18d   : > { %1657 = vmatpush3.msk.msra.mxu1 %vm631_vm1, %v1003_v39 }
 0x18e   : > { %v1109_v43 = vpop.permute.xlu1 %1108  ;;  %v1012_v44 = vpop.permute.xlu0 %1011  ;;  %1666 = vmatprep.subr.msk.mxu1 %vm631_vm1, %v1197_v42 }
 0x18f   : > { %1658 = vmatprep.mubr.msk.f32.mxu1 %vm624_vm2, %v1012_v44  ;;  %1663 = vmatprep.mubr.msk.f32.mxu0 %vm624_vm2, %v1109_v43 }
 0x190   : > { %1659 = vmatmul.mubr.msk.f32.vlgmr.msra.gmra.mrb[8].mxu1 %vm624_vm2, %v1014_v38  ;;  %1664 = vmatmul.mubr.msk.f32.vlgmr.msra.gmra.mrb[2].mxu0 %vm624_vm2, %v1111_v40 }
 0x191   : > { %1667 = vmatpush3.msk.msra.mxu1 %vm631_vm1, %v1197_v42  ;;  %1672 = vmatpush3.msk.msra.mxu0 %vm631_vm1, %v1294_v31 }
 0x192   : > { %v1303_v45 = vpop.permute.xlu1 %1302  ;;  %v1206_v46 = vpop.permute.xlu0 %1205 }
 0x193   : > { %1668 = vmatprep.mubr.msk.f32.mxu1 %vm624_vm2, %v1206_v46  ;;  %1673 = vmatprep.mubr.msk.f32.mxu0 %vm624_vm2, %v1303_v45 }
 0x196   : > { %v1305_v47 = vpop.permute.xlu1 %1304  ;;  %v1208_v48 = vpop.permute.xlu0 %1207 }
 0x197   : > { %1669 = vmatmul.mubr.msk.f32.vlgmr.msra.gmra.mrb[10].mxu1 %vm624_vm2, %v1208_v48  ;;  %1674 = vmatmul.mubr.msk.f32.vlgmr.msra.gmra.mrb[4].mxu0 %vm624_vm2, %v1305_v47 }
 0x1e1   : > { %v1640_v50 = vpop.f32.mrb[0].mxu1 }
 0x1e2   : > { %v707_v51 = vadd.f32 %v1640_v50, %v1515_v49  ;;  %v701_v52 = vpop.f32.mrb[1].mxu1 }
 0x1e3   : > { %v702_v53 = vadd.f32 %v1515_v49, %v701_v52 }
 0x1e4   : > { %711 = vst.msk [vmem:[%s2039_s12 + $0x8] sm:$0xff] %vm264_vm0, %v707_v51 }
 0x1e5   : > { %710 = vst.msk [vmem:[%s2039_s12] sm:$0xff] %vm264_vm0, %v702_v53 }
 0x257   : > { %v1645_v54 = vpop.f32.mrb[2].mxu1 }
 0x258   : > { %v803_v55 = vadd.f32 %v1645_v54, %v1515_v49  ;;  %v797_v56 = vpop.f32.mrb[3].mxu1 }
 0x259   : > { %v798_v57 = vadd.f32 %v1515_v49, %v797_v56 }
 0x25a   : > { %1524 = vst.msk [vmem:[%s2039_s12 + $0x18] sm:$0xff] %vm264_vm0, %v803_v55 }
 0x25b   : > { %1523 = vst.msk [vmem:[%s2039_s12 + $0x10] sm:$0xff] %vm264_vm0, %v798_v57  ;;  %v1650_v58 = vpop.f32.mrb[4].mxu1 }
 0x25c   : > { %v900_v59 = vadd.f32 %v1650_v58, %v1515_v49  ;;  %v894_v60 = vpop.f32.mrb[5].mxu1 }
 0x25d   : > { %v895_v61 = vadd.f32 %v1515_v49, %v894_v60 }
 0x25e   : > { %1530 = vst.msk [vmem:[%s2039_s12 + $0x28] sm:$0xff] %vm264_vm0, %v900_v59 }
 0x25f   : > { %1529 = vst.msk [vmem:[%s2039_s12 + $0x20] sm:$0xff] %vm264_vm0, %v895_v61  ;;  %v1655_v62 = vpop.f32.mrb[6].mxu1 }
 0x260   : > { %v997_v63 = vadd.f32 %v1655_v62, %v1515_v49  ;;  %v991_v0 = vpop.f32.mrb[7].mxu1 }
 0x261   : > { %v992_v1 = vadd.f32 %v1515_v49, %v991_v0 }
 0x262   : > { %1536 = vst.msk [vmem:[%s2039_s12 + $0x38] sm:$0xff] %vm264_vm0, %v997_v63 }
 0x263   : > { %1535 = vst.msk [vmem:[%s2039_s12 + $0x30] sm:$0xff] %vm264_vm0, %v992_v1  ;;  %v1660_v2 = vpop.f32.mrb[8].mxu1  ;;  %v1665_v3 = vpop.f32.mrb[2].mxu0 }
 0x264   : > { %v1094_v4 = vadd.f32 %v1660_v2, %v1515_v49  ;;  %v1191_v5 = vadd.f32 %v1665_v3, %v1515_v49  ;;  %v1088_v6 = vpop.f32.mrb[9].mxu1  ;;  %v1185_v7 = vpop.f32.mrb[3].mxu0 }
 0x265   : > { %v1089_v8 = vadd.f32 %v1515_v49, %v1088_v6  ;;  %v1186_v9 = vadd.f32 %v1515_v49, %v1185_v7 }
 0x266   : > { %1542 = vst.msk [vmem:[%s2039_s12 + $0x48] sm:$0xff] %vm264_vm0, %v1094_v4  ;;  %1548 = vst.msk [vmem:[%s2039_s12 + $0x58] sm:$0xff] %vm264_vm0, %v1191_v5 }
 0x267   : > { %1541 = vst.msk [vmem:[%s2039_s12 + $0x40] sm:$0xff] %vm264_vm0, %v1089_v8  ;;  %1547 = vst.msk [vmem:[%s2039_s12 + $0x50] sm:$0xff] %vm264_vm0, %v1186_v9 }
 0x26a   : > { %v1670_v10 = vpop.f32.mrb[10].mxu1  ;;  %v1675_v11 = vpop.f32.mrb[4].mxu0 }
 0x26b   : > { %v1288_v12 = vadd.f32 %v1670_v10, %v1515_v49  ;;  %v1385_v13 = vadd.f32 %v1675_v11, %v1515_v49  ;;  %v1282_v14 = vpop.f32.mrb[11].mxu1  ;;  %v1379_v15 = vpop.f32.mrb[5].mxu0 }
 0x26c   : > { %v1283_v16 = vadd.f32 %v1515_v49, %v1282_v14  ;;  %v1380_v17 = vadd.f32 %v1515_v49, %v1379_v15 }
 0x26d   : > { %1554 = vst.msk [vmem:[%s2039_s12 + $0x68] sm:$0xff] %vm264_vm0, %v1288_v12  ;;  %1560 = vst.msk [vmem:[%s2039_s12 + $0x78] sm:$0xff] %vm264_vm0, %v1385_v13 }
 0x26e   : > { %1553 = vst.msk [vmem:[%s2039_s12 + $0x60] sm:$0xff] %vm264_vm0, %v1283_v16  ;;  %1559 = vst.msk [vmem:[%s2039_s12 + $0x70] sm:$0xff] %vm264_vm0, %v1380_v17 }
 0x26f   : > { %1775 = shalt.err (!%p1772_p5)
}
 0x270   : > { %s1776_s7 = scalar_lea.hbm %s2070_s17, 2048  ;;  %s1780_s10 = scalar_lea.hbm %s2135_s5, 4096 }
 0x271   : > { %p1777_p6 = scmp.ne.s32.totalorder %s2070_s17, %s1776_s7  ;;  %p1781_p10 = scmp.lt.u32.totalorder %s2070_s17, %s2135_s5 }
 0x272   : > { %p1782_p11 = scmp.lt.u32.totalorder %s1780_s10, %s1776_s7  ;;  %p1784_p13 = scmp.lt.u32.totalorder %s1776_s7, %s2070_s17 }
 0x273   : > { %p1778_p7 = pnand %p1777_p6, %p1922_p4 }
 0x274   : > { %p1783_p12 = por %p1782_p11, %p1781_p10 }
 0x275   : > { %p1779_p9 = pneg %p1778_p7 }
 0x276   : > { %p1785_p0 = por %p1784_p13, %p1783_p12 }
 0x278   : > { %p1786_p1 = pnand %p1785_p0, %p1779_p9 }
 0x27a   : > { %1789 = shalt.err (!%p1786_p1)
}
 0x27b   : > { %s1850_s13 = smov 128   ;;  %s1851_s15 = smov 8  }
 0x27c   : > { %1698 = dma.vmem_to_hbm [thread:$0]  (%p1922_p4), %s2072_s14, 2048, %s2070_s17, %s2084_s21, %s1850_s13, %s1850_s13, %s1851_s15  }
 0x27d PF: > { %p1704_p2 = scmp.ge.s32.totalorder %s1840_s23, 2  ;;  %s1422_s16 = sand.u32 1, %s1820_s18  }
 0x27e   : > { %s1423_s24 = scalar_lea.sflag [#allocation3], %s1422_s16 }
 0x27f   : > { %p1701_p3 = pnand %p1704_p2, %p1929_p8 }
 0x281   : > { %1815 = dma.done.wait (!%p1701_p3), %s1423_s24, 2048  }
 0x282   : > { %1817 = vsyncadd (!%p1701_p3), %s1423_s24, 4294965248  ;;  %s18_s23 = sadd.s32 1, %s1840_s23   ;;  %s2138_s18 = smov %s1824_s19 }
 0x283   : > { %p15_p5 = scmp.ge.s32.totalorder %s18_s23, 4   ;;  %s2139_s19 = smov %s1828_s20 }
 0x284   : > { %s2140_s20 = smov %s1935_s6  ;;  %s2141_s21 = smov %s1836_s22 }
 0x285   : > { %s2142_s22 = smov %s2144_s26  ;;  %17 = sbr.rel (!%p15_p5) target bundleno = 4 (0x4), region = 88 }
 0x28c   :  { %1428 = vsyncpa [#allocation3], 1 }
 0x28d   :  { %1430 = vsyncpa [#allocation3 + $0x1], 1 }

</bundles_post_ra>
